<compile_context>
chip_gen: v5e
topology: v5e:2x2
jax: 0.10.0
libtpu: 0.0.40
codegen_flags: <defaults>
</compile_context>

<pallas_src>
from functools import partial

import jax
import jax.numpy as jnp
from jax.experimental import pallas as pl
from jax.experimental.pallas import tpu as pltpu


def _cond_block_kernel(x_ref, w_ref, g_ref, out_ref, *scratch,
                       K, c_in, L, padding, l_out, half, bb, taps_prebuilt):
    # x_ref  : (bb, C_in, L)        unpadded input block        (taps_prebuilt=False)
    #          (bb, K*C_in, L_out)  pre-de-interleaved taps      (taps_prebuilt=True)
    # w_ref  : (C_out, K*C_in)      folded conv weight, resident (DMA'd once)
    # g_ref  : (B, C_out, 1)        gamma(embed) for all batches, f32, resident
    # out_ref: (bb, half, L_out)    NCL output block (time on lanes -> lane-dense)
    # scratch: optional (K*C_in, L_out) VMEM tap-stacking buffer
    n = l_out
    denom = max(n - 1, 1)     # torch's unbiased std; guard the degenerate L_out == 1

    if not taps_prebuilt:
        (xcat_ref,) = scratch
        # Static per-tap column geometry: tap k of the conv reads
        # x_pad[:, t + k] == x[:, t + k - padding] for output position t.
        cols = []
        for k in range(K):
            c0 = min(max(0, padding - k), l_out)
            c1 = max(c0, min(l_out, padding - k + L))
            cols.append((c0, c1))
            rows = slice(k * c_in, (k + 1) * c_in)
            # Zero only the pad slivers.  Done every grid step: megacore-safe
            # (each core owns its own scratch) and tiny vs. the data copy below.
            if c0 > 0:
                xcat_ref[rows, 0:c0] = jnp.zeros((c_in, c0), xcat_ref.dtype)
            if c1 < l_out:
                xcat_ref[rows, c1:l_out] = jnp.zeros((c_in, l_out - c1),
                                                     xcat_ref.dtype)

    b0 = pl.program_id(0) * bb

    for i in range(bb):                                    # static, unrolled
        if taps_prebuilt:
            xcat = x_ref[i]                                # (K*C_in, L_out)
        else:
            # Stack the K lane-shifted taps along sublanes in VMEM.
            for k in range(K):
                c0, c1 = cols[k]
                if c1 > c0:
                    s0 = c0 - (padding - k)
                    xcat_ref[k * c_in:(k + 1) * c_in, c0:c1] = \
                        x_ref[i, :, s0:s0 + (c1 - c0)]
            xcat = xcat_ref[...]                           # (K*C_in, L_out)

        # Conv1d as ONE MXU contraction over K*C_in, f32 accumulation.
        # The conv bias is omitted: it provably cancels inside CIN.
        y = jnp.dot(w_ref[...], xcat, preferred_element_type=jnp.float32)  # (C_out, L_out)

        # CIN statistics in one f32 pass (sum / sum-of-squares).
        s1 = jnp.sum(y, axis=1, keepdims=True)             # (C_out, 1)
        s2 = jnp.sum(y * y, axis=1, keepdims=True)         # (C_out, 1)
        mu = s1 * (1.0 / n)
        var = jnp.maximum(s2 - mu * s1, 0.0) * (1.0 / denom)
        sigma = jnp.maximum(jnp.sqrt(var), 1e-7)

        gamma = g_ref[b0 + i]                              # (C_out, 1) f32
        beta = gamma      # reproduces the reference bug: beta uses the gamma Linear
        scale = gamma / sigma                              # tiny per-channel divide
        shift = beta - mu * scale
        z = y * scale + shift                              # one FMA over the big tile

        # GLU along channels: value half * sigmoid(gate half).
        out_ref[i] = (z[:half] * jax.nn.sigmoid(z[half:])).astype(out_ref.dtype)


def conditioning_block(x, embed, conv_w, conv_b, gamma_w, gamma_b, *,
                       stride, padding, compute_dtype=None, batch_block=1):
    """x: (B, C_in, L) NCL; embed: (B, E). Returns (B, C_out//2, L_out) NCL."""
    # conv_b has provably no effect on the output: CIN's mean subtraction removes
    # any per-channel constant and the unbiased std is shift-invariant.
    del conv_b
    B, C_in, L = x.shape
    C_out, _, K = conv_w.shape
    half = C_out // 2
    L_out = (L + 2 * padding - K) // stride + 1
    out_dtype = x.dtype
    # On v5e (lowest HBM BW) pass compute_dtype=jnp.bfloat16 to halve x/W DMA
    # bytes; statistics and CIN/GLU elementwise math stay in f32 either way.
    cdt = compute_dtype if compute_dtype is not None else x.dtype

    bb = batch_block
    assert B % bb == 0, "batch_block must divide the batch size"

    # Folded conv weight: contraction index r = k*C_in + i  <->  conv_w[o, i, k].
    w_flat = jnp.transpose(conv_w, (0, 2, 1)).reshape(C_out, K * C_in).astype(cdt)

    # gamma(embed) for every batch in one small f32 matmul (the reference's beta
    # re-uses the same Linear, so only gamma is needed).
    gamma = (embed.astype(jnp.float32) @ gamma_w.T.astype(jnp.float32)
             + gamma_b.astype(jnp.float32)).reshape(B, C_out, 1)

    taps_prebuilt = stride != 1
    if taps_prebuilt:
        # stride > 1: pre-de-interleave the strided taps so the kernel only sees
        # contiguous lane windows (in-kernel lane-strided slices lower poorly).
        x_pad = jnp.pad(x, ((0, 0), (0, 0), (padding, padding)))
        span = (L_out - 1) * stride + 1
        taps = jnp.stack([x_pad[:, :, k:k + span:stride] for k in range(K)],
                         axis=1)                                  # (B, K, C_in, L_out)
        x_in = taps.reshape(B, K * C_in, L_out).astype(cdt)
        x_block = (bb, K * C_in, L_out)
        scratch_shapes = []
    else:
        # stride == 1: ship the UNPADDED x; zero-padding + tap stacking happen
        # inside the kernel (no extra HBM pass over x).
        x_in = x.astype(cdt)
        x_block = (bb, C_in, L)
        scratch_shapes = [pltpu.VMEM((K * C_in, L_out), cdt)]

    # Generation-aware VMEM budget (v5e/v6e: 128 MiB physical, v7x: 64 MiB).
    try:
        cap = int(pltpu.get_tpu_info().vmem_capacity_bytes)
    except Exception:
        cap = 64 << 20
    item = jnp.dtype(cdt).itemsize
    x_blk_bytes = bb * x_block[1] * x_block[2] * item
    out_blk_bytes = bb * half * L_out * jnp.dtype(out_dtype).itemsize
    resident = C_out * K * C_in * item + B * C_out * 4
    scratch_bytes = 0 if taps_prebuilt else K * C_in * L_out * item
    temps = 8 * C_out * L_out * 4                   # y/z/GLU f32 temporaries + slack
    need = 2 * (x_blk_bytes + out_blk_bytes) + resident + scratch_bytes + temps
    vmem_limit = int(min(max(2 * need, 8 << 20), (3 * cap) // 4, 100 << 20))

    kernel = partial(_cond_block_kernel, K=K, c_in=C_in, L=L, padding=padding,
                     l_out=L_out, half=half, bb=bb, taps_prebuilt=taps_prebuilt)

    out = pl.pallas_call(
        kernel,
        out_shape=jax.ShapeDtypeStruct((B, half, L_out), out_dtype),
        grid=(B // bb,),
        in_specs=[
            pl.BlockSpec(x_block, lambda b: (b, 0, 0)),
            pl.BlockSpec((C_out, K * C_in), lambda b: (0, 0)),    # resident, DMA'd once
            pl.BlockSpec((B, C_out, 1), lambda b: (0, 0, 0)),     # resident, DMA'd once
        ],
        out_specs=pl.BlockSpec((bb, half, L_out), lambda b: (b, 0, 0)),
        scratch_shapes=scratch_shapes,
        compiler_params=pltpu.CompilerParams(
            dimension_semantics=("parallel",),
            vmem_limit_bytes=vmem_limit),
    )(x_in, w_flat, gamma)
    return out  # NCL: (B, C_out//2, L_out); time is the lane axis


def _reference(x, embed, conv_w, conv_b, gamma_w, gamma_b, stride, padding):
    """Pure-JAX reference matching the PyTorch forward (incl. the beta=gamma bug)."""
    y = jax.lax.conv_general_dilated(
        x, conv_w, window_strides=(stride,), padding=[(padding, padding)],
        dimension_numbers=("NCH", "OIH", "NCH"))
    y = y + conv_b[None, :, None]
    mu = jnp.mean(y, axis=2, keepdims=True)
    sigma = jnp.sqrt(jnp.sum((y - mu) ** 2, axis=2, keepdims=True)
                     / (y.shape[2] - 1))
    sigma = jnp.maximum(sigma, 1e-7)
    gamma = (embed @ gamma_w.T + gamma_b)[..., None]
    beta = gamma
    z = gamma * (y - mu) / sigma + beta
    half = z.shape[1] // 2
    return z[:, :half] * jax.nn.sigmoid(z[:, half:])


if __name__ == "__main__":
    # Small shapes consistent with the module.  dim_out=16 keeps half=8 (aligned
    # sublane split for the GLU); L=128 makes the time (lane) axis 128-wide.
    B, dim_in, L = 2, 4, 128
    dim_out, K, padding = 16, 3, 1
    embed_dim = 32

    key = jax.random.PRNGKey(0)
    kx, ke, kw, kb, kgw, kgb = jax.random.split(key, 6)

    x = jax.random.normal(kx, (B, dim_in, L), dtype=jnp.float32)
    embed = jax.random.normal(ke, (B, embed_dim), dtype=jnp.float32)
    conv_w = 0.1 * jax.random.normal(kw, (dim_out, dim_in, K), dtype=jnp.float32)
    conv_b = 0.1 * jax.random.normal(kb, (dim_out,), dtype=jnp.float32)
    gamma_w = 0.1 * jax.random.normal(kgw, (dim_out, embed_dim), dtype=jnp.float32)
    gamma_b = 0.1 * jax.random.normal(kgb, (dim_out,), dtype=jnp.float32)

    # --- stride=1, f32, one batch per grid step (tight check) ---
    ref1 = _reference(x, embed, conv_w, conv_b, gamma_w, gamma_b, 1, padding)
    out1 = jax.block_until_ready(conditioning_block(
        x, embed, conv_w, conv_b, gamma_w, gamma_b, stride=1, padding=padding))
    assert out1.shape == (B, dim_out // 2, (L + 2 * padding - K) + 1)
    assert bool(jnp.allclose(out1, ref1, atol=1e-4, rtol=1e-4))

    # --- stride=1, f32, both batches packed into one grid step ---
    out1b = jax.block_until_ready(conditioning_block(
        x, embed, conv_w, conv_b, gamma_w, gamma_b, stride=1, padding=padding,
        batch_block=2))
    assert bool(jnp.allclose(out1b, ref1, atol=1e-4, rtol=1e-4))

    # --- stride=1, bf16 MXU-input path (f32 stats / elementwise): loose check ---
    out_bf16 = jax.block_until_ready(conditioning_block(
        x, embed, conv_w, conv_b, gamma_w, gamma_b, stride=1, padding=padding,
        compute_dtype=jnp.bfloat16))
    assert bool(jnp.allclose(out_bf16, ref1, atol=1e-1, rtol=1e-1))

    # --- stride=2 path (wrapper-side tap de-interleave) ---
    ref2 = _reference(x, embed, conv_w, conv_b, gamma_w, gamma_b, 2, padding)
    out2 = jax.block_until_ready(conditioning_block(
        x, embed, conv_w, conv_b, gamma_w, gamma_b, stride=2, padding=padding))
    assert out2.shape == ref2.shape
    assert bool(jnp.allclose(out2, ref2, atol=1e-4, rtol=1e-4))

    print("KERNEL_OK")
</pallas_src>

<mosaic_0001>
module attributes {stable_mosaic.version = 11 : i64} {
  func.func @_cond_block_kernel(%arg0: i32, %arg1: memref<1x4x128xf32, #tpu.memory_space<vmem>>, %arg2: memref<16x12xf32, #tpu.memory_space<vmem>>, %arg3: memref<2x16x1xf32, #tpu.memory_space<vmem>>, %arg4: memref<1x8x128xf32, #tpu.memory_space<vmem>>, %arg5: memref<12x128xf32, #tpu.memory_space<vmem>>) attributes {dimension_semantics = [#tpu.dimension_semantics<parallel>], iteration_bounds = array<i64: 2>, scalar_prefetch = 0 : i64, scratch_operands = 1 : i64, tpu.core_type = #tpu.core_type<tc>, window_params = [{transform_indices = @transform_0, window_bounds = array<i64: 1, 4, 128>}, {pipeline_mode = #tpu.pipeline_mode<synchronous>, transform_indices = @transform_1, window_bounds = array<i64: 16, 12>}, {pipeline_mode = #tpu.pipeline_mode<synchronous>, transform_indices = @transform_2, window_bounds = array<i64: 2, 16, 1>}, {transform_indices = @transform_3, window_bounds = array<i64: 1, 8, 128>}]} {
    %cst = arith.constant 0.000000e+00 : f32
    %0 = vector.broadcast %cst : f32 to vector<4x1xf32>
    %c0 = arith.constant 0 : index
    %c0_0 = arith.constant 0 : index
    %1 = vector.load %arg5[%c0, %c0_0] : memref<12x128xf32, #tpu.memory_space<vmem>>, vector<4x1xf32>
    tpu.vector_store %arg5[%c0, %c0_0], %0 {strides = array<i32>} : memref<12x128xf32, #tpu.memory_space<vmem>>, vector<4x1xf32>,
    %cst_1 = arith.constant 0.000000e+00 : f32
    %2 = vector.broadcast %cst_1 : f32 to vector<4x1xf32>
    %c8 = arith.constant 8 : index
    %c127 = arith.constant 127 : index
    %3 = vector.load %arg5[%c8, %c127] : memref<12x128xf32, #tpu.memory_space<vmem>>, vector<4x1xf32>
    tpu.vector_store %arg5[%c8, %c127], %2 {strides = array<i32>} : memref<12x128xf32, #tpu.memory_space<vmem>>, vector<4x1xf32>,
    %c1_i32 = arith.constant 1 : i32
    %4 = arith.muli %arg0, %c1_i32 : i32
    %c0_2 = arith.constant 0 : index
    %c0_3 = arith.constant 0 : index
    %c0_4 = arith.constant 0 : index
    %5 = vector.load %arg1[%c0_2, %c0_3, %c0_4] : memref<1x4x128xf32, #tpu.memory_space<vmem>>, vector<1x4x127xf32>
    %6 = vector.shape_cast %5 : vector<1x4x127xf32> to vector<4x127xf32>
    %c0_5 = arith.constant 0 : index
    %c1 = arith.constant 1 : index
    %7 = vector.load %arg5[%c0_5, %c1] : memref<12x128xf32, #tpu.memory_space<vmem>>, vector<4x127xf32>
    tpu.vector_store %arg5[%c0_5, %c1], %6 {strides = array<i32>} : memref<12x128xf32, #tpu.memory_space<vmem>>, vector<4x127xf32>,
    %c0_6 = arith.constant 0 : index
    %c0_7 = arith.constant 0 : index
    %c0_8 = arith.constant 0 : index
    %8 = vector.load %arg1[%c0_6, %c0_7, %c0_8] : memref<1x4x128xf32, #tpu.memory_space<vmem>>, vector<1x4x128xf32>
    %9 = vector.shape_cast %8 : vector<1x4x128xf32> to vector<4x128xf32>
    %c4 = arith.constant 4 : index
    %c0_9 = arith.constant 0 : index
    %10 = vector.load %arg5[%c4, %c0_9] : memref<12x128xf32, #tpu.memory_space<vmem>>, vector<4x128xf32>
    tpu.vector_store %arg5[%c4, %c0_9], %9 {strides = array<i32>} : memref<12x128xf32, #tpu.memory_space<vmem>>, vector<4x128xf32>,
    %c0_10 = arith.constant 0 : index
    %c0_11 = arith.constant 0 : index
    %c1_12 = arith.constant 1 : index
    %11 = vector.load %arg1[%c0_10, %c0_11, %c1_12] : memref<1x4x128xf32, #tpu.memory_space<vmem>>, vector<1x4x127xf32>
    %12 = vector.shape_cast %11 : vector<1x4x127xf32> to vector<4x127xf32>
    %c8_13 = arith.constant 8 : index
    %c0_14 = arith.constant 0 : index
    %13 = vector.load %arg5[%c8_13, %c0_14] : memref<12x128xf32, #tpu.memory_space<vmem>>, vector<4x127xf32>
    tpu.vector_store %arg5[%c8_13, %c0_14], %12 {strides = array<i32>} : memref<12x128xf32, #tpu.memory_space<vmem>>, vector<4x127xf32>,
    %c0_15 = arith.constant 0 : index
    %c0_16 = arith.constant 0 : index
    %14 = vector.load %arg5[%c0_15, %c0_16] : memref<12x128xf32, #tpu.memory_space<vmem>>, vector<12x128xf32>
    %c0_17 = arith.constant 0 : index
    %c0_18 = arith.constant 0 : index
    %15 = vector.load %arg2[%c0_17, %c0_18] : memref<16x12xf32, #tpu.memory_space<vmem>>, vector<16x12xf32>
    %cst_19 = arith.constant dense<0.000000e+00> : vector<16x128xf32>
    %16 = tpu.matmul %15, %14, %cst_19 {dimension_numbers = #tpu.dot_dimension_numbers<[1], [0], [0], [1], [0, 0, 1, 1], [], []>} : vector<16x12xf32>, vector<12x128xf32>, vector<16x128xf32> -> vector<16x128xf32>
    %cst_20 = arith.constant dense<0.000000e+00> : vector<16xf32>
    %17 = vector.multi_reduction <add>, %16, %cst_20 [1] : vector<16x128xf32> to vector<16xf32>
    %18 = vector.shape_cast %17 : vector<16xf32> to vector<16x1xf32>
    %19 = arith.mulf %16, %16 : vector<16x128xf32>
    %cst_21 = arith.constant dense<0.000000e+00> : vector<16xf32>
    %20 = vector.multi_reduction <add>, %19, %cst_21 [1] : vector<16x128xf32> to vector<16xf32>
    %21 = vector.shape_cast %20 : vector<16xf32> to vector<16x1xf32>
    %cst_22 = arith.constant 7.812500e-03 : f32
    %22 = vector.broadcast %cst_22 : f32 to vector<16x1xf32>
    %23 = arith.mulf %18, %22 : vector<16x1xf32>
    %24 = arith.mulf %23, %18 : vector<16x1xf32>
    %25 = arith.subf %21, %24 : vector<16x1xf32>
    %cst_23 = arith.constant 0.000000e+00 : f32
    %26 = vector.broadcast %cst_23 : f32 to vector<16x1xf32>
    %27 = arith.maximumf %25, %26 : vector<16x1xf32>
    %cst_24 = arith.constant 0.00787401571 : f32
    %28 = vector.broadcast %cst_24 : f32 to vector<16x1xf32>
    %29 = arith.mulf %27, %28 : vector<16x1xf32>
    %30 = math.sqrt %29 : vector<16x1xf32>
    %cst_25 = arith.constant 1.000000e-07 : f32
    %31 = vector.broadcast %cst_25 : f32 to vector<16x1xf32>
    %32 = arith.maximumf %30, %31 : vector<16x1xf32>
    %c0_i32 = arith.constant 0 : i32
    %33 = arith.addi %4, %c0_i32 : i32
    %34 = arith.index_cast %33 : i32 to index
    %c0_26 = arith.constant 0 : index
    %c0_27 = arith.constant 0 : index
    %35 = vector.load %arg3[%34, %c0_26, %c0_27] : memref<2x16x1xf32, #tpu.memory_space<vmem>>, vector<1x16x1xf32>
    %36 = vector.shape_cast %35 : vector<1x16x1xf32> to vector<16x1xf32>
    %37 = arith.divf %36, %32 : vector<16x1xf32>
    %38 = arith.mulf %23, %37 : vector<16x1xf32>
    %39 = arith.subf %36, %38 : vector<16x1xf32>
    %40 = vector.broadcast %37 : vector<16x1xf32> to vector<16x128xf32>
    %41 = arith.mulf %16, %40 : vector<16x128xf32>
    %42 = vector.broadcast %39 : vector<16x1xf32> to vector<16x128xf32>
    %43 = arith.addf %41, %42 : vector<16x128xf32>
    %44 = vector.extract_strided_slice %43 {offsets = [0, 0], sizes = [8, 128], strides = [1, 1]} : vector<16x128xf32> to vector<8x128xf32>
    %45 = vector.extract_strided_slice %43 {offsets = [8, 0], sizes = [8, 128], strides = [1, 1]} : vector<16x128xf32> to vector<8x128xf32>
    %46 = arith.negf %45 : vector<8x128xf32>
    %47 = math.exp %46 : vector<8x128xf32>
    %cst_28 = arith.constant 1.000000e+00 : f32
    %48 = vector.broadcast %cst_28 : f32 to vector<8x128xf32>
    %49 = arith.addf %48, %47 : vector<8x128xf32>
    %50 = arith.divf %48, %49 : vector<8x128xf32>
    %51 = arith.mulf %44, %50 : vector<8x128xf32>
    %c0_29 = arith.constant 0 : index
    %c0_30 = arith.constant 0 : index
    %c0_31 = arith.constant 0 : index
    %52 = vector.load %arg4[%c0_29, %c0_30, %c0_31] : memref<1x8x128xf32, #tpu.memory_space<vmem>>, vector<1x8x128xf32>
    %53 = vector.shape_cast %52 : vector<1x8x128xf32> to vector<8x128xf32>
    %54 = vector.shape_cast %51 : vector<8x128xf32> to vector<1x8x128xf32>
    tpu.vector_store %arg4[%c0_29, %c0_30, %c0_31], %54 {strides = array<i32>} : memref<1x8x128xf32, #tpu.memory_space<vmem>>, vector<1x8x128xf32>,
    return
  }
  func.func @transform_0(%arg0: i32) -> (i32, i32, i32) {
    %c0_i32 = arith.constant 0 : i32
    %c0_i32_0 = arith.constant 0 : i32
    %c0_i32_1 = arith.constant 0 : i32
    return %arg0, %c0_i32, %c0_i32_0 : i32, i32, i32
  }
  func.func @transform_1(%arg0: i32) -> (i32, i32) {
    %c0_i32 = arith.constant 0 : i32
    %c0_i32_0 = arith.constant 0 : i32
    %c0_i32_1 = arith.constant 0 : i32
    return %c0_i32, %c0_i32_0 : i32, i32
  }
  func.func @transform_2(%arg0: i32) -> (i32, i32, i32) {
    %c0_i32 = arith.constant 0 : i32
    %c0_i32_0 = arith.constant 0 : i32
    %c0_i32_1 = arith.constant 0 : i32
    %c0_i32_2 = arith.constant 0 : i32
    return %c0_i32, %c0_i32_0, %c0_i32_1 : i32, i32, i32
  }
  func.func @transform_3(%arg0: i32) -> (i32, i32, i32) {
    %c0_i32 = arith.constant 0 : i32
    %c0_i32_0 = arith.constant 0 : i32
    %c0_i32_1 = arith.constant 0 : i32
    return %arg0, %c0_i32, %c0_i32_0 : i32, i32, i32
  }
}

</mosaic_0001>

<bundles_post_ra>
// kernel: tpu_custom_call.1
= control target key start
LH: loop header
LB: loop body
LE: loop exit
PB: predicated region body
PF: predicated region fallthrough
CT: control target
= control target key end

     0   :  { %8 = vsyncpa [#allocation4], 0  ;;  %s708_s0 = inlined_call_operand.vmem [shape: f32[2,4,128], index: 0, kind: input, shape index: {}]   ;;  %s709_s1 = inlined_call_operand.vmem [shape: f32[16,12], index: 1, kind: input, shape index: {}]   ;;  %s710_s2 = inlined_call_operand.vmem [shape: f32[2,16,1], index: 2, kind: input, shape index: {}]   ;;  %s711_s3 = inlined_call_operand.hbm [shape: f32[2,8,128], index: 3, kind: output, shape index: {}]  }
   0x1   :  { %10 = vsyncpa [#allocation4 + $0x1], 0  ;;  %s593_s12 = smov 0   ;;  %s595_s13 = smov 0  }
   0x2   :  { %s597_s14 = smov 0   ;;  %s599_s15 = smov 0  }
   0x3 LB: > { %s614_s16 = sadd.s32 4294967295, %s567_s15   ;;  %s430_s17 = sadd.s32 4294967294, %s567_s15   ;;  %s567_s15 = sphi %s599_s15, %s717_s15   ;;  %s563_s14 = sphi %s597_s14, %s716_s14   ;;  %s559_s13 = sphi %s595_s13, %s715_s13   ;;  %s555_s12 = sphi %s593_s12, %s714_s12  }
   0x4   : > { %s618_s18 = sadd.s32 1, %s567_s15   ;;  %s91_s19 = sadd.s32 1, %s563_s14 }
   0x5   : > { %s88_s20 = ssub.s32 %s567_s15, %s618_s18  ;;  %p101_p0 = scmp.ne.s32.totalorder %s563_s14, %s559_s13 }
   0x6   : > { %p89_p1 = scmp.eq.s32.totalorder %s88_s20, 0  ;;  %p102_p2 = scmp.eq.s32.totalorder %s614_s16, 1 }
   0x7   : > { %p107_p3 = scmp.ne.s32.totalorder %s559_s13, %s555_s12  ;;  %p108_p4 = scmp.eq.s32.totalorder %s430_s17, 1 }
   0x8   : > { %s629_s21 = scalar_select %p89_p1, %s563_s14, %s91_s19  }
   0x9   : > { %p631_p5 = por %p102_p2, %p101_p0  ;;  %p635_p6 = por %p108_p4, %p107_p3 }
   0xa   : > { %p433_p7 = scmp.ge.s32.totalorder %s567_s15, 1  ;;  %p139_p8 = scmp.lt.s32.totalorder %s567_s15, 3 }
   0xc   : > { %p140_p9 = pnand %p433_p7, %p139_p8 }
   0xd   : > { %p162_p10 = scmp.lt.s32.totalorder (!%p140_p9), %s614_s16, 1  ;;  %s570_s29 = smov (!%p140_p9), 127  }
   0xe   : > { %143 = sbr.rel (%p140_p9) target bundleno = 608 (0x260), region = 32  ;;  %s571_s30 = smov (!%p140_p9), 1  }
   0xf   : > { %s439_s8 = sshll.u32 (!%p140_p9), %s614_s16, 4  ;;  %s159_s17 = sand.u32 (!%p140_p9), 1, %s559_s13  }
  0x10   : > { %s271_s11 = scalar_lea.vmem (!%p140_p9), %s710_s2, %s439_s8  ;;  %s434_s19 = sshll.u32 (!%p140_p9), %s159_s17, 3 }
  0x11   : > { %s442_s20 = sshll.u32 (!%p140_p9), %s614_s16, 3  ;;  %s161_s27 = scalar_lea.vmem (!%p140_p9), [#allocation3], %s434_s19 }
  0x12   : > { %s364_s26 = scalar_lea.hbm (!%p140_p9), %s711_s3, %s442_s20  ;;  %s525_s7 = scalar_lea.hbm (!%p140_p9), %s711_s3, 16 }
  0x13   : > { %vm168_vm0 = vcmask 1044472   ;;  %v569_v0 = vmov 0.0   ;;  %s163_s24 = scalar_select %p162_p10, %s614_s16, 1  ;;  %vm166_vm1 = vcmask 3072   ;;  %vm184_vm2 = vcmask 1035264   ;;  %v188_v7 = vld [vmem:[%s709_s1] sm:$0xff] }
  0x14   : > { %169 = vst.msk [vmem:[#allocation2 + $0x8] sm:$0xf] %vm168_vm0, %v569_v0  ;;  %vm175_vm3 = vcmask 1043464   ;;  %vm197_vm4 = vcmask 1043456   ;;  %vm190_vm5 = vcmask 97280   ;;  %v189_v8 = vld [vmem:[%s709_s1 + $0x8] sm:$0xff] }
  0x15   : > { %s435_s25 = sshll.u32 %s163_s24, 2  ;;  %167 = vst.msk [vmem:[#allocation2] sm:$0xf] %vm166_vm1, %v569_v0  ;;  %v572_v17 = vmov 0   ;;  %v273_v0 = vld [vmem:[%s271_s11 + $0x8] sm:$0xff]  ;;  %s366_s16 = sshll.u32 %s161_s27, 4  ;;  %s367_s16 = int_to_ptr.vmem [resolvable:$true] %s366_s16 }
  0x16   : > { %s165_s28 = scalar_lea.vmem %s708_s0, %s435_s25  ;;  %492 = vset.pattern.permute.xlu2 %v572_v17  ;;  %490 = vset.pattern.permute.xlu0 %v572_v17 }
  0x17   : > { %v179_v1 = vld [vmem:[%s165_s28] sm:$0xf]  ;;  %491 = vset.pattern.permute.xlu1 %v572_v17 }
  0x18   : > { %v177_v2 = vld [vmem:[%s165_s28] sm:$0xf]  ;;  %181 = vrot.lane.b32.xlu0 %v179_v1, %s570_s29  ;;  %s354_s29 = scalar_lea.sflag [#allocation4], %s159_s17 }
  0x19   : > { %178 = vst [vmem:[#allocation2 + $0x4] sm:$0xf] %v177_v2  ;;  %v170_v3 = vld [vmem:[%s165_s28] sm:$0xf]  ;;  %s368_s28 = sshll.u32 %s364_s26, 4  ;;  %s369_s28 = int_to_ptr.hbm [resolvable:$true] %s368_s28 }
  0x20   : > { %172 = vrot.lane.b32.xlu0 %v170_v3, %s571_s30  ;;  %s519_s30 = sshra.s32 %s369_s28, 4  ;;  %s520_s30 = int_to_ptr.hbm [resolvable:$true] %s519_s30 }
  0x21   : > { %s521_s4 = scalar_lea.hbm %s520_s30, 8  ;;  %p526_p0 = scmp.lt.s32.totalorder %s520_s30, %s711_s3 }
  0x22   : > { %p522_p11 = scmp.ne.s32.totalorder %s520_s30, %s521_s4  ;;  %p527_p1 = scmp.lt.s32.totalorder %s525_s7, %s521_s4 }
  0x24   : > { %p523_p12 = pnand %p522_p11, %p631_p5  ;;  %p528_p2 = por %p527_p1, %p526_p0 }
  0x26   : > { %p524_p13 = pneg %p523_p12 }
  0x28   : > { %p529_p3 = pnand %p528_p2, %p524_p13 }
  0x8a   : > { %v182_v4 = vpop.permute.xlu0 %181 }
  0x8b   : > { %185 = vst.msk [vmem:[#allocation2 + $0x8] sm:$0xf] %vm184_vm2, %v182_v4  ;;  %v272_v4 = vld [vmem:[%s271_s11] sm:$0xff] }
  0x92   : > { %v173_v5 = vpop.permute.xlu0 %172  ;;  %v187_v6 = vld [vmem:[#allocation2 + $0x8] sm:$0xf] }
  0x93   : > { %176 = vst.msk [vmem:[#allocation2] sm:$0xf] %vm175_vm3, %v173_v5  ;;  %436 = vmatpush.msk.msra.mxu0 %vm197_vm4, %v187_v6  ;;  %445 = vmatpush.msk.msra.mxu1 %vm197_vm4, %v187_v6 }
  0x9a   : > { %v186_v9 = vld [vmem:[#allocation2] sm:$0xff] }
  0x9b   : > { %216 = vmatpush.msra.mxu0 %v186_v9  ;;  %446 = vmatpush.msra.mxu1 %v186_v9 }
  0x9c   : > { %437 = vmatmul.msk.f32.vlgmr.msra.gmra.mxu0 %vm190_vm5, %v188_v7  ;;  %438 = vmatmul.msk.f32.vlgmr.msra.gmra.mxu1 %vm190_vm5, %v189_v8 }
 0x119   : > { %v652_v10 = vpop.f32.mrf.mxu0  ;;  %v654_v11 = vpop.f32.mrf.mxu1 }
 0x11a   : > { %226 = vadd.xlane.f32.xlu1 %v654_v11  ;;  %224 = vadd.xlane.f32.xlu2 %v652_v10  ;;  %v228_v12 = vmul.f32 %v652_v10, %v652_v10  ;;  %v229_v13 = vmul.f32 %v654_v11, %v654_v11 }
 0x122   : > { %232 = vadd.xlane.f32.xlu1 %v229_v13  ;;  %230 = vadd.xlane.f32.xlu2 %v228_v12 }
 0x18d   : > { %v227_v14 = vpop.xlane.xlu1 %226  ;;  %v225_v15 = vpop.xlane.xlu2 %224 }
 0x18e   : > { %v662_v16 = vmul.f32 0.0078125, %v225_v15  ;;  %v664_v18 = vmul.f32 0.0078125, %v227_v14 }
 0x190   : > { %v236_v19 = vmul.f32 %v662_v16, %v225_v15  ;;  %v237_v20 = vmul.f32 %v664_v18, %v227_v14 }
 0x195   : > { %v233_v21 = vpop.xlane.xlu1 %232  ;;  %v231_v22 = vpop.xlane.xlu2 %230 }
 0x196   : > { %v239_v23 = vsub.f32 %v233_v21, %v237_v20  ;;  %v238_v24 = vsub.f32 %v231_v22, %v236_v19 }
 0x198   : > { %v241_v25 = vmax.f32 %v239_v23, 0.0  ;;  %v240_v26 = vmax.f32 %v238_v24, 0.0 }
 0x19a   : > { %v243_v27 = vmul.f32 0.007874016, %v241_v25  ;;  %v242_v28 = vmul.f32 0.007874016, %v240_v26 }
 0x19c   : > { %493 = vrsqrt.f32 %v243_v27  ;;  %vm251_vm6 = vcmp.eq.f32.partialorder %v242_v28, inf  ;;  %v254_v42 = vand.u32 2147483648, %v242_v28  ;;  %vm263_vm7 = vcmp.eq.f32.partialorder %v243_v27, inf }
 0x19d   : > { %495 = vrsqrt.f32 %v242_v28  ;;  %v266_v44 = vand.u32 2147483648, %v243_v27  ;;  %vm253_vm8 = vcmp.eq.f32.partialorder %v242_v28, 0.0  ;;  %vm265_vm9 = vcmp.eq.f32.partialorder %v243_v27, 0.0 }
 0x1a2   : > { %v494_v29 = vpop.eup %493 }
 0x1a3   : > { %v496_v30 = vpop.eup %495  ;;  %v257_v31 = vmul.f32 %v494_v29, %v243_v27 }
 0x1a4   : > { %v245_v32 = vmul.f32 %v496_v30, %v242_v28 }
 0x1a5   : > { %v258_v33 = vmul.f32 %v494_v29, %v257_v31 }
 0x1a6   : > { %v246_v34 = vmul.f32 %v496_v30, %v245_v32 }
 0x1a7   : > { %v259_v35 = vmul.f32 0.5, %v258_v33 }
 0x1a8   : > { %v247_v36 = vmul.f32 0.5, %v246_v34 }
 0x1a9   : > { %v260_v37 = vsub.f32 1.5, %v259_v35 }
 0x1aa   : > { %v248_v38 = vsub.f32 1.5, %v247_v36 }
 0x1ab   : > { %v261_v39 = vmul.f32 %v494_v29, %v260_v37 }
 0x1ac   : > { %v249_v40 = vmul.f32 %v496_v30, %v248_v38 }
 0x1ad   : > { %v262_v41 = vmul.f32 %v261_v39, %v243_v27 }
 0x1ae   : > { %v250_v43 = vmul.f32 %v249_v40, %v242_v28 }
 0x1af   : > { %v264_v45 = vsel %vm263_vm7, %v243_v27, %v262_v41 }
 0x1b0   : > { %v267_v46 = vsel %vm265_vm9, %v266_v44, %v264_v45  ;;  %v252_v47 = vsel %vm251_vm6, %v242_v28, %v250_v43 }
 0x1b1   : > { %v269_v48 = vmax.f32 %v267_v46, 1e-07  ;;  %v255_v49 = vsel %vm253_vm8, %v254_v42, %v252_v47 }
 0x1b2   : > { %v268_v50 = vmax.f32 %v255_v49, 1e-07 }
 0x1b3   : > { %497 = vrcp.f32 %v269_v48  ;;  %v300_v56 = vand.u32 2147483648, %v269_v48  ;;  %v298_v59 = vand.u32 2147483647, %v269_v48  ;;  %vm294_vm12 = vweird.f32 %v269_v48 }
 0x1b4   : > { %499 = vrcp.f32 %v268_v50  ;;  %v285_v60 = vand.u32 2147483648, %v268_v50  ;;  %v283_v62 = vand.u32 2147483647, %v268_v50  ;;  %vm279_vm14 = vweird.f32 %v268_v50 }
 0x1b5   : > { %v301_v1 = vor.u32 1.1754944e-38, %v300_v56  ;;  %vm299_vm15 = vcmp.eq.f32.partialorder %v298_v59, 8.507059e+37 }
 0x1b6   : > { %v286_v5 = vor.u32 1.1754944e-38, %v285_v60  ;;  %vm284_vm1 = vcmp.eq.f32.partialorder %v283_v62, 8.507059e+37 }
 0x1b9   : > { %v498_v51 = vpop.eup %497 }
 0x1ba   : > { %v500_v52 = vpop.eup %499  ;;  %v290_v53 = vmul.f32 %v498_v51, %v269_v48  ;;  %vm295_vm10 = vweird.f32 %v498_v51 }
 0x1bb   : > { %v275_v54 = vmul.f32 %v500_v52, %v268_v50  ;;  %vm280_vm11 = vweird.f32 %v500_v52  ;;  %vm296_vm13 = vmor %vm294_vm12, %vm295_vm10 }
 0x1bc   : > { %v291_v55 = vsub.f32 1.0, %v290_v53  ;;  %vm281_vm0 = vmor %vm279_vm14, %vm280_vm11 }
 0x1bd   : > { %v276_v57 = vsub.f32 1.0, %v275_v54 }
 0x1be   : > { %v292_v58 = vmul.f32 %v498_v51, %v291_v55 }
 0x1bf   : > { %v277_v61 = vmul.f32 %v500_v52, %v276_v57 }
 0x1c0   : > { %v293_v63 = vadd.f32 %v498_v51, %v292_v58 }
 0x1c1   : > { %v278_v2 = vadd.f32 %v500_v52, %v277_v61 }
 0x1c2   : > { %v297_v3 = vsel %vm296_vm13, %v498_v51, %v293_v63 }
 0x1c3   : > { %v302_v6 = vsel %vm299_vm15, %v301_v1, %v297_v3  ;;  %v282_v7 = vsel %vm281_vm0, %v500_v52, %v278_v2 }
 0x1c4   : > { %v303_v8 = vmul.f32 %v302_v6, %v273_v0  ;;  %v287_v9 = vsel %vm284_vm1, %v286_v5, %v282_v7 }
 0x1c5   : > { %v288_v12 = vmul.f32 %v287_v9, %v272_v4 }
 0x1c6   : > { %315 = vperm.xlu0 %490, %v303_v8   ;;  %v305_v13 = vmul.f32 %v303_v8, %v664_v18 }
 0x1c7   : > { %310 = vperm.xlu2 %492, %v288_v12   ;;  %v304_v15 = vmul.f32 %v288_v12, %v662_v16 }
 0x1c8   : > { %v307_v14 = vsub.f32 %v273_v0, %v305_v13 }
 0x1c9   : > { %v306_v17 = vsub.f32 %v272_v4, %v304_v15 }
 0x1ca   : > { %327 = vperm.xlu1 %491, %v307_v14  }
 0x1ce   : > { %322 = vperm.xlu0 %490, %v306_v17  }
 0x221   : > { %v311_v27 = vpop.permute.xlu2 %310 }
 0x222   : > { %v318_v31 = vmul.f32 %v311_v27, %v652_v10 }
 0x238   : > { %v316_v19 = vpop.permute.xlu0 %315 }
 0x239   : > { %v319_v20 = vmul.f32 %v316_v19, %v654_v11 }
 0x23c   : > { %v328_v21 = vpop.permute.xlu1 %327 }
 0x23d   : > { %v331_v22 = vadd.f32 %v328_v21, %v319_v20 }
 0x23f   : > { %v440_v23 = vmul.f32 -1.442695, %v331_v22 }
 0x240   : > { %v323_v11 = vpop.permute.xlu0 %322 }
 0x241   : > { %501 = vpow2.f32 %v440_v23  ;;  %v330_v35 = vadd.f32 %v323_v11, %v318_v31 }
 0x247   : > { %v502_v24 = vpop.eup %501 }
 0x248   : > { %v335_v25 = vadd.f32 1.0, %v502_v24 }
 0x24a   : > { %503 = vrcp.f32 %v335_v25  ;;  %v347_v28 = vand.u32 2147483648, %v335_v25  ;;  %v345_v30 = vand.u32 2147483647, %v335_v25  ;;  %vm341_vm3 = vweird.f32 %v335_v25 }
 0x24c   : > { %v348_v33 = vor.u32 1.1754944e-38, %v347_v28  ;;  %vm346_vm5 = vcmp.eq.f32.partialorder %v345_v30, 8.507059e+37 }
 0x250   : > { %v504_v18 = vpop.eup %503 }
 0x251   : > { %v337_v26 = vmul.f32 %v504_v18, %v335_v25  ;;  %vm342_vm2 = vweird.f32 %v504_v18 }
 0x252   : > { %vm343_vm4 = vmor %vm341_vm3, %vm342_vm2 }
 0x253   : > { %v338_v16 = vsub.f32 1.0, %v337_v26 }
 0x255   : > { %v339_v29 = vmul.f32 %v504_v18, %v338_v16 }
 0x257   : > { %v340_v32 = vadd.f32 %v504_v18, %v339_v29 }
 0x259   : > { %v344_v34 = vsel %vm343_vm4, %v504_v18, %v340_v32 }
 0x25a   : > { %v349_v36 = vsel %vm346_vm5, %v348_v33, %v344_v34 }
 0x25b   : > { %v351_v37 = vmul.f32 %v349_v36, %v330_v35 }
 0x25d   : > { %352 = vst [vmem:[%s161_s27] sm:$0xff] %v351_v37 }
 0x25e   : > { %532 = shalt.err (!%p529_p3)
}
 0x25f   : > { %447 = dma.vmem_to_hbm [thread:$0]  (%p631_p5), %s367_s16, 128, %s369_s28, %s354_s29  }
 0x260 PF: > { %p453_p4 = scmp.ge.s32.totalorder %s567_s15, 2  ;;  %s380_s10 = sand.u32 1, %s555_s12  }
 0x261   : > { %s381_s11 = scalar_lea.sflag [#allocation4], %s380_s10 }
 0x262   : > { %p450_p7 = pnand %p453_p4, %p635_p6 }
 0x264   : > { %p451_p8 = pneg %p450_p7 }
 0x266   : > { %550 = dma.done.wait (%p451_p8), %s381_s11, 128  }
 0x267   : > { %552 = vsyncadd (%p451_p8), %s381_s11, 4294967168  ;;  %p13_p9 = scmp.ge.s32.totalorder %s618_s18, 4   ;;  %s714_s12 = smov %s559_s13 }
 0x268   : > { %s715_s13 = smov %s563_s14  ;;  %s716_s14 = smov %s629_s21 }
 0x269   : > { %s717_s15 = smov %s618_s18  ;;  %15 = sbr.rel (!%p13_p9) target bundleno = 3 (0x3), region = 68 }
 0x26e   :  { %387 = vsyncpa [#allocation4], 1 }
 0x26f   :  { %389 = vsyncpa [#allocation4 + $0x1], 1 }

</bundles_post_ra>
